<compile_context>
chip_gen: v7x
topology: tpu7x:2x2x1
jax: 0.10.0
libtpu: 0.0.40
codegen_flags: <defaults>
</compile_context>

<pallas_src>
import functools

import jax
import jax.numpy as jnp
from jax.experimental import pallas as pl
from jax.experimental.pallas import tpu as pltpu


def _embracenet_kernel(xcat_ref, w_ref, b_ref, avail_ref, selprob_ref, u_ref,
                       out_ref, *, E):
    """One batch tile of EmbraceNet (M = 2).

    xcat_ref    : (TB, D0+D1)  concatenated modality inputs
    w_ref       : (D0+D1, 2E)  block-diagonal docking weight (VMEM-resident)
    b_ref       : (1, 2E)      concatenated docking bias     (VMEM-resident)
    avail_ref   : (TB, 2)      availabilities
    selprob_ref : (TB, 2)      selection probabilities
    u_ref       : (TB, E)      uniform[0,1) samples for the multinomial draw
    out_ref     : (TB, E)      embracement output
    """
    # ---- fused docking: a single MXU pass computes both modalities ----
    d = jnp.dot(xcat_ref[...], w_ref[...], preferred_element_type=jnp.float32)
    d = jnp.maximum(d + b_ref[...], 0.0)          # Linear + forward relu
    d0 = d[:, :E]                                 # docking output, modality 0
    d1 = d[:, E:]                                 # docking output, modality 1

    # ---- selection weights (M == 2), divide-free ----
    # Instead of normalizing (p / sum), scale the uniform sample by the
    # unnormalized total:  u * (p0 + p1) < p0   <=>   u < p0 / (p0 + p1).
    p0 = selprob_ref[:, 0:1] * avail_ref[:, 0:1]  # (TB, 1)
    p1 = selprob_ref[:, 1:2] * avail_ref[:, 1:2]  # (TB, 1)
    pick0 = u_ref[...] * (p0 + p1) < p0           # (TB, E) bool

    # ---- embrace: per (row, feature) select the sampled modality's output ----
    out_ref[...] = jnp.where(pick0, d0, d1).astype(out_ref.dtype)


def embracenet_forward(x_list, weights, biases, availabilities,
                       selection_probabilities, rng_key, *, block_b=512):
    """Plain-JAX glue around the batch-tiled Pallas kernel (M = 2 modalities)."""
    assert len(x_list) == 2 and len(weights) == 2 and len(biases) == 2, \
        "this kernel instance is specialized for M = 2 modalities"
    B, D0 = x_list[0].shape
    D1 = x_list[1].shape[1]
    E = weights[0].shape[1]
    M = 2
    Dcat = D0 + D1
    f32 = jnp.float32

    # TODO(synk): on v6e/v7x, feed x_cat / w_bd as bfloat16 (keeping f32 MXU
    # accumulation via preferred_element_type) to halve the dominant HBM bytes.
    x_cat = jnp.concatenate([x_list[0].astype(f32), x_list[1].astype(f32)],
                            axis=1)                                   # (B, Dcat)

    w_bd = jnp.zeros((Dcat, 2 * E), f32)                              # block-diagonal weight
    w_bd = w_bd.at[:D0, :E].set(weights[0].astype(f32))
    w_bd = w_bd.at[D0:, E:].set(weights[1].astype(f32))
    b_cat = jnp.concatenate(
        [biases[0].reshape(-1), biases[1].reshape(-1)]).astype(f32).reshape(1, 2 * E)

    # Uniform samples for the multinomial draw (inverse CDF happens in-kernel).
    u = jax.random.uniform(rng_key, (B, E), dtype=f32)

    avail = availabilities.astype(f32)
    selprob = selection_probabilities.astype(f32)

    # Batch tile: block_b rows per grid step when it divides B, otherwise the
    # whole batch in one step.  block_b * (Dcat + 2E + M + E) * 4 bytes, double
    # buffered, stays far below v7x's 64 MiB VMEM at the default 512.
    tb = block_b if (B % block_b == 0) else B
    grid = (B // tb,)

    kernel = functools.partial(_embracenet_kernel, E=E)

    return pl.pallas_call(
        kernel,
        out_shape=jax.ShapeDtypeStruct((B, E), f32),
        grid=grid,
        in_specs=[
            pl.BlockSpec((tb, Dcat), lambda i: (i, 0)),       # x_cat   : batch-tiled
            pl.BlockSpec((Dcat, 2 * E), lambda i: (0, 0)),    # w_bd    : resident
            pl.BlockSpec((1, 2 * E), lambda i: (0, 0)),       # b_cat   : resident
            pl.BlockSpec((tb, M), lambda i: (i, 0)),          # avail   : batch-tiled
            pl.BlockSpec((tb, M), lambda i: (i, 0)),          # selprob : batch-tiled
            pl.BlockSpec((tb, E), lambda i: (i, 0)),          # uniforms: batch-tiled
        ],
        out_specs=pl.BlockSpec((tb, E), lambda i: (i, 0)),
        compiler_params=pltpu.CompilerParams(
            dimension_semantics=("parallel",)),
    )(x_cat, w_bd, b_cat, avail, selprob, u)


if __name__ == "__main__":
    # Small synthetic config consistent with the module:
    #   input_size_list = [64, 48], embracement_size = 32, docker_arch = [[32], [32]]
    B, E = 8, 32
    D = [64, 48]
    M = len(D)

    key = jax.random.PRNGKey(0)
    keys = jax.random.split(key, 8)

    x0 = jax.random.normal(keys[0], (B, D[0]), dtype=jnp.float32)
    x1 = jax.random.normal(keys[1], (B, D[1]), dtype=jnp.float32)

    # Deterministic docking Linear params (nn.Linear(inC, E) per modality).
    w0 = jax.random.normal(keys[2], (D[0], E), dtype=jnp.float32) * 0.05
    b0 = jax.random.normal(keys[3], (E,), dtype=jnp.float32) * 0.05
    w1 = jax.random.normal(keys[4], (D[1], E), dtype=jnp.float32) * 0.05
    b1 = jax.random.normal(keys[5], (E,), dtype=jnp.float32) * 0.05

    # Defaults from the forward pass: all-ones availabilities / selection probs.
    avail = jnp.ones((B, M), dtype=jnp.float32)
    selprob = jnp.ones((B, M), dtype=jnp.float32)

    out = embracenet_forward([x0, x1], [w0, w1], [b0, b1], avail, selprob, keys[6])
    out = jax.block_until_ready(out)

    # Sanity check: every output element must equal the corresponding element of
    # one of the (relu'd) docking outputs, computed by a plain-JAX reference.
    d0 = jnp.maximum(x0 @ w0 + b0[None, :], 0.0)
    d1 = jnp.maximum(x1 @ w1 + b1[None, :], 0.0)
    match = jnp.minimum(jnp.abs(out - d0), jnp.abs(out - d1))
    assert out.shape == (B, E)
    assert bool(jnp.all(jnp.isfinite(out)))
    assert float(jnp.max(match)) < 1e-3, "each output element must come from one modality"

    print("KERNEL_OK")
</pallas_src>

<mosaic_0001>
module attributes {stable_mosaic.version = 11 : i64} {
  func.func @_embracenet_kernel(%arg0: i32, %arg1: memref<8x112xf32, #tpu.memory_space<vmem>>, %arg2: memref<112x64xf32, #tpu.memory_space<vmem>>, %arg3: memref<1x64xf32, #tpu.memory_space<vmem>>, %arg4: memref<8x2xf32, #tpu.memory_space<vmem>>, %arg5: memref<8x2xf32, #tpu.memory_space<vmem>>, %arg6: memref<8x32xf32, #tpu.memory_space<vmem>>, %arg7: memref<8x32xf32, #tpu.memory_space<vmem>>) attributes {dimension_semantics = [#tpu.dimension_semantics<parallel>], iteration_bounds = array<i64: 1>, scalar_prefetch = 0 : i64, scratch_operands = 0 : i64, tpu.core_type = #tpu.core_type<tc>, window_params = [{transform_indices = @transform_0, window_bounds = array<i64: 8, 112>}, {pipeline_mode = #tpu.pipeline_mode<synchronous>, transform_indices = @transform_1, window_bounds = array<i64: 112, 64>}, {pipeline_mode = #tpu.pipeline_mode<synchronous>, transform_indices = @transform_2, window_bounds = array<i64: 1, 64>}, {transform_indices = @transform_3, window_bounds = array<i64: 8, 2>}, {transform_indices = @transform_4, window_bounds = array<i64: 8, 2>}, {transform_indices = @transform_5, window_bounds = array<i64: 8, 32>}, {transform_indices = @transform_6, window_bounds = array<i64: 8, 32>}]} {
    %c0 = arith.constant 0 : index
    %c0_0 = arith.constant 0 : index
    %0 = vector.load %arg1[%c0, %c0_0] : memref<8x112xf32, #tpu.memory_space<vmem>>, vector<8x112xf32>
    %c0_1 = arith.constant 0 : index
    %c0_2 = arith.constant 0 : index
    %1 = vector.load %arg2[%c0_1, %c0_2] : memref<112x64xf32, #tpu.memory_space<vmem>>, vector<112x64xf32>
    %cst = arith.constant dense<0.000000e+00> : vector<8x64xf32>
    %2 = tpu.matmul %0, %1, %cst {dimension_numbers = #tpu.dot_dimension_numbers<[1], [0], [0], [1], [0, 0, 1, 1], [], []>} : vector<8x112xf32>, vector<112x64xf32>, vector<8x64xf32> -> vector<8x64xf32>
    %c0_3 = arith.constant 0 : index
    %c0_4 = arith.constant 0 : index
    %3 = vector.load %arg3[%c0_3, %c0_4] : memref<1x64xf32, #tpu.memory_space<vmem>>, vector<1x64xf32>
    %4 = vector.broadcast %3 : vector<1x64xf32> to vector<8x64xf32>
    %5 = arith.addf %2, %4 : vector<8x64xf32>
    %cst_5 = arith.constant 0.000000e+00 : f32
    %6 = vector.broadcast %cst_5 : f32 to vector<8x64xf32>
    %7 = arith.maximumf %5, %6 : vector<8x64xf32>
    %8 = vector.extract_strided_slice %7 {offsets = [0, 0], sizes = [8, 32], strides = [1, 1]} : vector<8x64xf32> to vector<8x32xf32>
    %9 = vector.extract_strided_slice %7 {offsets = [0, 32], sizes = [8, 32], strides = [1, 1]} : vector<8x64xf32> to vector<8x32xf32>
    %c0_6 = arith.constant 0 : index
    %c0_7 = arith.constant 0 : index
    %10 = vector.load %arg5[%c0_6, %c0_7] : memref<8x2xf32, #tpu.memory_space<vmem>>, vector<8x1xf32>
    %c0_8 = arith.constant 0 : index
    %c0_9 = arith.constant 0 : index
    %11 = vector.load %arg4[%c0_8, %c0_9] : memref<8x2xf32, #tpu.memory_space<vmem>>, vector<8x1xf32>
    %12 = arith.mulf %10, %11 : vector<8x1xf32>
    %c0_10 = arith.constant 0 : index
    %c1 = arith.constant 1 : index
    %13 = vector.load %arg5[%c0_10, %c1] : memref<8x2xf32, #tpu.memory_space<vmem>>, vector<8x1xf32>
    %c0_11 = arith.constant 0 : index
    %c1_12 = arith.constant 1 : index
    %14 = vector.load %arg4[%c0_11, %c1_12] : memref<8x2xf32, #tpu.memory_space<vmem>>, vector<8x1xf32>
    %15 = arith.mulf %13, %14 : vector<8x1xf32>
    %c0_13 = arith.constant 0 : index
    %c0_14 = arith.constant 0 : index
    %16 = vector.load %arg6[%c0_13, %c0_14] : memref<8x32xf32, #tpu.memory_space<vmem>>, vector<8x32xf32>
    %17 = arith.addf %12, %15 : vector<8x1xf32>
    %18 = vector.broadcast %17 : vector<8x1xf32> to vector<8x32xf32>
    %19 = arith.mulf %16, %18 : vector<8x32xf32>
    %20 = vector.broadcast %12 : vector<8x1xf32> to vector<8x32xf32>
    %21 = arith.cmpf olt, %19, %20 : vector<8x32xf32>
    %22 = arith.select %21, %8, %9 : vector<8x32xi1>, vector<8x32xf32>
    %c0_15 = arith.constant 0 : index
    %c0_16 = arith.constant 0 : index
    %23 = vector.load %arg7[%c0_15, %c0_16] : memref<8x32xf32, #tpu.memory_space<vmem>>, vector<8x32xf32>
    tpu.vector_store %arg7[%c0_15, %c0_16], %22 {strides = array<i32>} : memref<8x32xf32, #tpu.memory_space<vmem>>, vector<8x32xf32>,
    return
  }
  func.func @transform_0(%arg0: i32) -> (i32, i32) {
    %c0_i32 = arith.constant 0 : i32
    %c0_i32_0 = arith.constant 0 : i32
    return %arg0, %c0_i32 : i32, i32
  }
  func.func @transform_1(%arg0: i32) -> (i32, i32) {
    %c0_i32 = arith.constant 0 : i32
    %c0_i32_0 = arith.constant 0 : i32
    %c0_i32_1 = arith.constant 0 : i32
    return %c0_i32, %c0_i32_0 : i32, i32
  }
  func.func @transform_2(%arg0: i32) -> (i32, i32) {
    %c0_i32 = arith.constant 0 : i32
    %c0_i32_0 = arith.constant 0 : i32
    %c0_i32_1 = arith.constant 0 : i32
    return %c0_i32, %c0_i32_0 : i32, i32
  }
  func.func @transform_3(%arg0: i32) -> (i32, i32) {
    %c0_i32 = arith.constant 0 : i32
    %c0_i32_0 = arith.constant 0 : i32
    return %arg0, %c0_i32 : i32, i32
  }
  func.func @transform_4(%arg0: i32) -> (i32, i32) {
    %c0_i32 = arith.constant 0 : i32
    %c0_i32_0 = arith.constant 0 : i32
    return %arg0, %c0_i32 : i32, i32
  }
  func.func @transform_5(%arg0: i32) -> (i32, i32) {
    %c0_i32 = arith.constant 0 : i32
    %c0_i32_0 = arith.constant 0 : i32
    return %arg0, %c0_i32 : i32, i32
  }
  func.func @transform_6(%arg0: i32) -> (i32, i32) {
    %c0_i32 = arith.constant 0 : i32
    %c0_i32_0 = arith.constant 0 : i32
    return %arg0, %c0_i32 : i32, i32
  }
}

</mosaic_0001>

<bundles_post_ra>
// kernel: tpu_custom_call.1
= control target key start
LH: loop header
LB: loop body
LE: loop exit
PB: predicated region body
PF: predicated region fallthrough
CT: control target
= control target key end

     0   :  { %v264_v3 = vmov 0.0|0.0   ;;  %vm265_vm0 = vmmov 0   ;;  %v266_v6 = vmov 0.0   ;;  %v267_v7 = vmov 0   ;;  %s375_s0 = inlined_call_operand.vmem [shape: f32[8,112], index: 0, kind: input, shape index: {}]   ;;  %s376_s1 = inlined_call_operand.vmem [shape: f32[112,64], index: 1, kind: input, shape index: {}]   ;;  %s377_s2 = inlined_call_operand.vmem [shape: f32[1,64], index: 2, kind: input, shape index: {}]   ;;  %s378_s3 = inlined_call_operand.vmem [shape: f32[8,2], index: 3, kind: input, shape index: {}]   ;;  %s379_s4 = inlined_call_operand.vmem [shape: f32[8,2], index: 4, kind: input, shape index: {}]   ;;  %s380_s5 = inlined_call_operand.vmem [shape: f32[8,32], index: 5, kind: input, shape index: {}]   ;;  %s381_s6 = inlined_call_operand.hbm [shape: f32[8,32], index: 6, kind: output, shape index: {}]  }
   0x1   :  { %v25_v0 = vld [vmem:[%s376_s1] sm:$0xff]  ;;  %v26_v1 = vld [vmem:[%s376_s1 + $0x8] sm:$0xff]  ;;  %v27_v2 = vld [vmem:[%s376_s1 + $0x10] sm:$0xff]  ;;  %210 = vmatprep.subr.bf16.mxu0 %v264_v3  ;;  %207 = vmatprep.mubr.msk.f32.mxu0 %vm265_vm0, %v266_v6 }
   0x2   :  { %v211_v4 = vpack.c.bf16 %v26_v1, %v25_v0  ;;  %v28_v5 = vld [vmem:[%s376_s1 + $0x18] sm:$0xff]  ;;  %238 = vset.pattern.permute.xlu0 %v267_v7  ;;  %239 = vset.pattern.permute.xlu1 %v267_v7  ;;  %v29_v9 = vld [vmem:[%s376_s1 + $0x20] sm:$0xff]  ;;  %v30_v10 = vld [vmem:[%s376_s1 + $0x28] sm:$0xff] }
   0x3   :  { %v214_v8 = vpack.c.bf16 %v28_v5, %v27_v2  ;;  %v121_v11 = vld [vmem:[%s379_s4] sm:$0xff] }
   0x4   :  { %212 = vmatpush3.bf16.msra.mxu0 %v211_v4  ;;  %v122_v12 = vld [vmem:[%s378_s3] sm:$0xff] }
   0x5   :  { %213 = vmatprep.subr.bf16.mxu0 %v264_v3  ;;  %v123_v13 = vmul.f32 %v122_v12, %v121_v11 }
   0x6   :  { %11 = vsyncpa [#allocation3], 0  ;;  %v217_v14 = vpack.c.bf16 %v30_v10, %v29_v9  ;;  %v31_v15 = vld [vmem:[%s376_s1 + $0x30] sm:$0xff]  ;;  %v32_v16 = vld [vmem:[%s376_s1 + $0x38] sm:$0xff]  ;;  %s268_s17 = smov 127   ;;  %vm46_vm1 = vcmask 916480  }
   0x7   :  { %126 = vrot.lane.b32.xlu0 %v123_v13, %s268_s17  ;;  %137 = vperm.xlu1 %239, %v123_v13   ;;  %v220_v17 = vpack.c.bf16 %v32_v16, %v31_v15  ;;  %v33_v18 = vld [vmem:[%s376_s1 + $0x40] sm:$0xff]  ;;  %v34_v19 = vld [vmem:[%s376_s1 + $0x48] sm:$0xff]  ;;  %v35_v21 = vld [vmem:[%s376_s1 + $0x50] sm:$0xff]  ;;  %vm146_vm2 = vcmask 261120  }
   0x8   :  { %215 = vmatpush3.bf16.msra.mxu0 %v214_v8  ;;  %v223_v20 = vpack.c.bf16 %v34_v19, %v33_v18  ;;  %v36_v22 = vld [vmem:[%s376_s1 + $0x58] sm:$0xff]  ;;  %v37_v24 = vld [vmem:[%s376_s1 + $0x60] sm:$0xff]  ;;  %v38_v25 = vld [vmem:[%s376_s1 + $0x68] sm:$0xff]  ;;  %s269_s1 = smov 96  }
   0x9   :  { %216 = vmatprep.subr.bf16.mxu0 %v264_v3  ;;  %v226_v23 = vpack.c.bf16 %v36_v22, %v35_v21  ;;  %v229_v26 = vpack.c.bf16 %v38_v25, %v37_v24  ;;  %v24_v27 = vld [vmem:[%s375_s0] sm:$0xff]  ;;  %s270_s0 = smov [#allocation2]  }
   0xa   :  { %v162_v30 = vld [vmem:[%s377_s2] ss:$0 sm:$0xff]  ;;  %s154_s10 = sshll.u32 %s270_s0, 4  ;;  %s155_s10 = int_to_ptr.vmem [resolvable:$true] %s154_s10 }
   0xb   :  { %v124_v35 = vld [vmem:[%s380_s5] sm:$0xff]  ;;  %s240_s2 = scalar_lea.vmem %s155_s10, 128  ;;  %p245_p1 = scmp.lt.s32.totalorder %s155_s10, %s155_s10 }
   0xc   :  { %218 = vmatpush3.bf16.msra.mxu0 %v217_v14  ;;  %p241_p0 = scmp.ne.s32.totalorder %s155_s10, %s240_s2  ;;  %p246_p2 = scmp.lt.s32.totalorder %s240_s2, %s240_s2 }
   0xd   :  { %219 = vmatprep.subr.bf16.mxu0 %v264_v3 }
   0xe   :  { %p247_p3 = por %p246_p2, %p245_p1 }
  0x10   :  { %221 = vmatpush3.bf16.msra.mxu0 %v220_v17  ;;  %p248_p4 = pnand %p247_p3, %p241_p0 }
  0x11   :  { %222 = vmatprep.subr.bf16.mxu0 %v264_v3 }
  0x14   :  { %224 = vmatpush3.bf16.msra.mxu0 %v223_v20 }
  0x15   :  { %225 = vmatprep.subr.bf16.mxu0 %v264_v3 }
  0x18   :  { %227 = vmatpush3.bf16.msra.mxu0 %v226_v23 }
  0x19   :  { %228 = vmatprep.subr.bf16.mxu0 %v264_v3 }
  0x1c   :  { %230 = vmatpush3.bf16.msra.mxu0 %v229_v26 }
  0x1f   :  { %208 = vmatmul.mubr.msk.f32.vlgmr.msra.gmra.mrb[0].mxu0 %vm46_vm1, %v24_v27 }
  0x79   :  { %v127_v28 = vpop.permute.xlu0 %126 }
  0x7a   :  { %v129_v29 = vadd.f32 %v127_v28, %v123_v13 }
  0x7c   :  { %132 = vperm.xlu0 %238, %v129_v29  }
  0x86   :  { %v138_v37 = vpop.permute.xlu1 %137 }
  0xf2   :  { %v116_v31 = vpop.f32.mrb[0].mxu0 }
  0xf3   :  { %v117_v32 = vadd.f32 %v162_v30, %v116_v31  ;;  %v209_v33 = vpop.f32.mrb[1].mxu0 }
  0xf5   :  { %v120_v34 = vmax.f32 %v117_v32, 0.0 }
  0xf7   :  { %142 = vrot.lane.b32.xlu1 %v120_v34, %s269_s1 }
  0xfb   :  { %v133_v36 = vpop.permute.xlu0 %132 }
  0xfc   :  { %v135_v38 = vmul.f32 %v133_v36, %v124_v35 }
  0xfe   :  { %vm140_vm3 = vcmp.lt.f32.partialorder %v135_v38, %v138_v37 }
 0x169   :  { %v143_v39 = vpop.permute.xlu1 %142 }
 0x16a   :  { %v145_v40 = vsel %vm140_vm3, %v120_v34, %v143_v39 }
 0x16b   :  { %147 = vst.msk [vmem:[#allocation2] sm:$0xff] %vm146_vm2, %v145_v40 }
 0x16c   :  { %251 = shalt.err (!%p248_p4)
}
 0x16d   :  { %s252_s12 = scalar_lea.hbm %s381_s6, 128 }
 0x16e   :  { %p253_p5 = scmp.ne.s32.totalorder %s381_s6, %s252_s12  ;;  %p256_p6 = scmp.lt.u32.totalorder %s252_s12, %s381_s6 }
 0x170   :  { %p258_p7 = pnand %p256_p6, %p253_p5 }
 0x172   :  { %261 = shalt.err (!%p258_p7)
}
 0x173   :  { %157 = dma.vmem_to_hbm [thread:$0]  %s155_s10, 128, %s381_s6, [#allocation3]  }
 0x174   :  { %262 = dma.done.wait [#allocation3], 128  }
 0x175   :  { %263 = vsyncadd [#allocation3], 4294967168 }
 0x176   :  { %161 = vsyncpa [#allocation3], 1 }

</bundles_post_ra>
